<compile_context>
chip_gen: v6e
topology: v6e:2x2x1
jax: 0.10.0
libtpu: 0.0.40
codegen_flags: <defaults>
</compile_context>

<pallas_src>
import functools

import jax
import jax.numpy as jnp
from jax.experimental import pallas as pl
from jax.experimental.pallas import tpu as pltpu


def _fold_kernel(x_ref, o_ref, *, n_w, C, ph, pw, rows):
    """x_ref: (1, rows, n_w, C*ph*pw) lane-dense;  o_ref: (1, C, rows*ph, W) dense."""
    W = n_w * pw
    cp = C * ph
    x = x_ref[0]                                # (rows, n_w, K)   one dense load
    # Split each token's lane dim (c, p, q) -> ((c*ph + p), q).
    x = x.reshape(rows, n_w, cp, pw)            # (rows, n_w, cp, pw)
    # Move q next to the patch-column index j (minor-2 swap: the supported transpose form).
    x = jnp.swapaxes(x, -1, -2)                 # (rows, n_w, pw, cp)
    # Merge (j, q) -> image width W; lane dim (cp) untouched.
    x = x.reshape(rows, W, cp)                  # (rows, W, cp)
    # Bring (c, p) back to the sublane side, W to the lane side.
    x = jnp.swapaxes(x, -1, -2)                 # (rows, cp, W)
    # Split (c, p); lane dim (W) untouched.
    x = x.reshape(rows, C, ph, W)               # (rows, C, ph, W)
    # One dense, unmasked (rows*ph, W) store per channel (sublane- and lane-dense).
    # TODO(synk): switch to a channel grid axis if C is ever large enough to make this unroll
    #             or the output block exceed the VMEM budget (typical Seq2Image C is tiny).
    for c in range(C):
        o_ref[0, c] = x[:, c].reshape(rows * ph, W)


def _round_up(v, m):
    return (v + m - 1) // m * m


def _padded_block_bytes(block_shape, itemsize, sub):
    """VMEM bytes of a block after (sublane, lane) tile padding."""
    lead = 1
    for d in block_shape[:-2]:
        lead *= d
    return lead * _round_up(block_shape[-2], sub) * _round_up(block_shape[-1], 128) * itemsize


def _vmem_limit_bytes():
    """Generation-aware VMEM limit: half of physical, capped at 64 MiB (headroom on v7x)."""
    cap = 128 * 1024 * 1024
    try:
        info = pltpu.get_tpu_info()
        cap = int(getattr(info, "vmem_capacity_bytes", cap)) or cap
    except Exception:
        pass
    return min(64 * 1024 * 1024, max(16 * 1024 * 1024, cap // 2))


def _pick_rows(n_h, n_w, ph, C, K, W, itemsize, budget_bytes, batch):
    """Largest divisor of n_h whose (padded, double-buffered) in+out blocks fit the budget,
    preferring enough grid steps to keep pipelining / both v7x cores busy."""
    sub = {1: 32, 2: 16}.get(itemsize, 8)       # sublane tile for the dtype
    feasible = []
    for r in range(1, n_h + 1):
        if n_h % r:
            continue
        # Output block (1, C, r*ph, W): second-to-last dim must be tile-aligned or full.
        if r != n_h and (r * ph) % sub != 0:
            continue
        in_bytes = _padded_block_bytes((1, r, n_w, K), itemsize, sub)
        out_bytes = _padded_block_bytes((1, C, r * ph, W), itemsize, sub)
        if 2 * (in_bytes + out_bytes) > budget_bytes:   # x2: double buffering
            continue
        feasible.append(r)
    if not feasible:
        # TODO(synk): add a channel-tile grid axis for gigantic C*H*W blocks; fall back to n_h.
        return n_h
    # Prefer the biggest block that still leaves enough grid steps for pipelining / megacore.
    for min_steps in (8, 4, 2):
        good = [r for r in feasible if batch * (n_h // r) >= min_steps]
        if good:
            return max(good)
    return max(feasible)


def seq2image(x, *, channels, image_size, patch_size):
    """Pallas equivalent of Seq2Image.forward: x (B, L, C*ph*pw) -> (B, C, H, W)."""
    if isinstance(patch_size, int):
        patch_size = (patch_size, patch_size)
    if isinstance(image_size, int):
        image_size = (image_size, image_size)
    ph, pw = patch_size
    H, W = image_size
    assert H % ph == 0 and W % pw == 0, "image size must be divisible by patch size"
    n_h, n_w = H // ph, W // pw
    B, L, K = x.shape
    assert L == n_h * n_w, "sequence length must equal number of patches"
    assert K == channels * ph * pw, "token dim must equal C*ph*pw"

    itemsize = x.dtype.itemsize
    vmem_limit = _vmem_limit_bytes()
    rows = _pick_rows(n_h, n_w, ph, channels, K, W, itemsize,
                      budget_bytes=int(vmem_limit * 0.6), batch=B)

    # Free (row-major) view only: split L -> (nH, nW); the token lane stays packed (lane-dense).
    x4 = x.reshape(B, n_h, n_w, K)

    kernel = functools.partial(_fold_kernel, n_w=n_w, C=channels, ph=ph, pw=pw, rows=rows)

    return pl.pallas_call(
        kernel,
        out_shape=jax.ShapeDtypeStruct((B, channels, H, W), x.dtype),
        grid=(B, n_h // rows),
        in_specs=[
            # One contiguous slab of `rows` patch-rows; trailing dims (n_w, K) are full dims.
            pl.BlockSpec((1, rows, n_w, K), lambda b, r: (b, r, 0, 0)),
        ],
        out_specs=pl.BlockSpec(
            # Dense (C, rows*ph, W) slab written straight into the NCHW result.
            (1, channels, rows * ph, W), lambda b, r: (b, 0, r, 0),
        ),
        compiler_params=pltpu.CompilerParams(
            dimension_semantics=("parallel", "parallel"),   # pure copy: no reduction axis
            vmem_limit_bytes=vmem_limit,
        ),
        cost_estimate=pl.CostEstimate(
            flops=0, transcendentals=0, bytes_accessed=2 * x.size * itemsize,
        ),
    )(x4)


if __name__ == "__main__":
    # Small shapes consistent with the module: 16x16 image, 2x2 patches, 4 channels.
    B, C = 2, 4
    H = W = 16
    ph = pw = 2
    nH, nW = H // ph, W // pw
    L, K = nH * nW, C * ph * pw          # L = 64, K = 16

    key = jax.random.PRNGKey(0)
    x = jax.random.normal(key, (B, L, K), dtype=jnp.float32)

    out = seq2image(x, channels=C, image_size=(H, W), patch_size=(ph, pw))
    out = jax.block_until_ready(out)

    # Pure-JAX reference of F.fold(x.swapaxes(1, 2), output_size, kernel, stride=kernel).
    ref = (
        x.reshape(B, nH, nW, C, ph, pw)
        .transpose(0, 3, 1, 4, 2, 5)
        .reshape(B, C, H, W)
    )
    assert out.shape == (B, C, H, W)
    assert out.dtype == x.dtype
    assert jnp.allclose(out, ref), "Pallas fold kernel mismatch vs reference"
    print("KERNEL_OK")
</pallas_src>

<mosaic_0001>
module attributes {stable_mosaic.version = 11 : i64} {
  func.func @_fold_kernel(%arg0: i32, %arg1: i32, %arg2: memref<1x4x8x16xf32, #tpu.memory_space<vmem>>, %arg3: memref<1x4x8x16xf32, #tpu.memory_space<vmem>>) attributes {dimension_semantics = [#tpu.dimension_semantics<parallel>, #tpu.dimension_semantics<parallel>], iteration_bounds = array<i64: 2, 2>, scalar_prefetch = 0 : i64, scratch_operands = 0 : i64, tpu.core_type = #tpu.core_type<tc>, window_params = [{transform_indices = @transform_0, window_bounds = array<i64: 1, 4, 8, 16>}, {transform_indices = @transform_1, window_bounds = array<i64: 1, 4, 8, 16>}]} {
    %c0 = arith.constant 0 : index
    %c0_0 = arith.constant 0 : index
    %c0_1 = arith.constant 0 : index
    %c0_2 = arith.constant 0 : index
    %0 = vector.load %arg2[%c0, %c0_0, %c0_1, %c0_2] : memref<1x4x8x16xf32, #tpu.memory_space<vmem>>, vector<1x4x8x16xf32>
    %1 = vector.shape_cast %0 : vector<1x4x8x16xf32> to vector<4x8x16xf32>
    %2 = vector.shape_cast %1 : vector<4x8x16xf32> to vector<4x8x8x2xf32>
    %3 = tpu.transpose %2, [0, 1, 3, 2] : vector<4x8x8x2xf32> -> vector<4x8x2x8xf32>
    %4 = vector.shape_cast %3 : vector<4x8x2x8xf32> to vector<4x16x8xf32>
    %5 = tpu.transpose %4, [0, 2, 1] : vector<4x16x8xf32> -> vector<4x8x16xf32>
    %6 = vector.shape_cast %5 : vector<4x8x16xf32> to vector<4x4x2x16xf32>
    %7 = vector.extract_strided_slice %6 {offsets = [0, 0, 0, 0], sizes = [4, 1, 2, 16], strides = [1, 1, 1, 1]} : vector<4x4x2x16xf32> to vector<4x1x2x16xf32>
    %8 = vector.shape_cast %7 : vector<4x1x2x16xf32> to vector<4x2x16xf32>
    %9 = vector.shape_cast %8 : vector<4x2x16xf32> to vector<8x16xf32>
    %c0_3 = arith.constant 0 : index
    %c0_4 = arith.constant 0 : index
    %c0_5 = arith.constant 0 : index
    %c0_6 = arith.constant 0 : index
    %10 = vector.load %arg3[%c0_3, %c0_4, %c0_5, %c0_6] : memref<1x4x8x16xf32, #tpu.memory_space<vmem>>, vector<1x1x8x16xf32>
    %11 = vector.shape_cast %10 : vector<1x1x8x16xf32> to vector<8x16xf32>
    %12 = vector.shape_cast %9 : vector<8x16xf32> to vector<1x1x8x16xf32>
    tpu.vector_store %arg3[%c0_3, %c0_4, %c0_5, %c0_6], %12 {strides = array<i32>} : memref<1x4x8x16xf32, #tpu.memory_space<vmem>>, vector<1x1x8x16xf32>,
    %13 = vector.extract_strided_slice %6 {offsets = [0, 1, 0, 0], sizes = [4, 1, 2, 16], strides = [1, 1, 1, 1]} : vector<4x4x2x16xf32> to vector<4x1x2x16xf32>
    %14 = vector.shape_cast %13 : vector<4x1x2x16xf32> to vector<4x2x16xf32>
    %15 = vector.shape_cast %14 : vector<4x2x16xf32> to vector<8x16xf32>
    %c0_7 = arith.constant 0 : index
    %c1 = arith.constant 1 : index
    %c0_8 = arith.constant 0 : index
    %c0_9 = arith.constant 0 : index
    %16 = vector.load %arg3[%c0_7, %c1, %c0_8, %c0_9] : memref<1x4x8x16xf32, #tpu.memory_space<vmem>>, vector<1x1x8x16xf32>
    %17 = vector.shape_cast %16 : vector<1x1x8x16xf32> to vector<8x16xf32>
    %18 = vector.shape_cast %15 : vector<8x16xf32> to vector<1x1x8x16xf32>
    tpu.vector_store %arg3[%c0_7, %c1, %c0_8, %c0_9], %18 {strides = array<i32>} : memref<1x4x8x16xf32, #tpu.memory_space<vmem>>, vector<1x1x8x16xf32>,
    %19 = vector.extract_strided_slice %6 {offsets = [0, 2, 0, 0], sizes = [4, 1, 2, 16], strides = [1, 1, 1, 1]} : vector<4x4x2x16xf32> to vector<4x1x2x16xf32>
    %20 = vector.shape_cast %19 : vector<4x1x2x16xf32> to vector<4x2x16xf32>
    %21 = vector.shape_cast %20 : vector<4x2x16xf32> to vector<8x16xf32>
    %c0_10 = arith.constant 0 : index
    %c2 = arith.constant 2 : index
    %c0_11 = arith.constant 0 : index
    %c0_12 = arith.constant 0 : index
    %22 = vector.load %arg3[%c0_10, %c2, %c0_11, %c0_12] : memref<1x4x8x16xf32, #tpu.memory_space<vmem>>, vector<1x1x8x16xf32>
    %23 = vector.shape_cast %22 : vector<1x1x8x16xf32> to vector<8x16xf32>
    %24 = vector.shape_cast %21 : vector<8x16xf32> to vector<1x1x8x16xf32>
    tpu.vector_store %arg3[%c0_10, %c2, %c0_11, %c0_12], %24 {strides = array<i32>} : memref<1x4x8x16xf32, #tpu.memory_space<vmem>>, vector<1x1x8x16xf32>,
    %25 = vector.extract_strided_slice %6 {offsets = [0, 3, 0, 0], sizes = [4, 1, 2, 16], strides = [1, 1, 1, 1]} : vector<4x4x2x16xf32> to vector<4x1x2x16xf32>
    %26 = vector.shape_cast %25 : vector<4x1x2x16xf32> to vector<4x2x16xf32>
    %27 = vector.shape_cast %26 : vector<4x2x16xf32> to vector<8x16xf32>
    %c0_13 = arith.constant 0 : index
    %c3 = arith.constant 3 : index
    %c0_14 = arith.constant 0 : index
    %c0_15 = arith.constant 0 : index
    %28 = vector.load %arg3[%c0_13, %c3, %c0_14, %c0_15] : memref<1x4x8x16xf32, #tpu.memory_space<vmem>>, vector<1x1x8x16xf32>
    %29 = vector.shape_cast %28 : vector<1x1x8x16xf32> to vector<8x16xf32>
    %30 = vector.shape_cast %27 : vector<8x16xf32> to vector<1x1x8x16xf32>
    tpu.vector_store %arg3[%c0_13, %c3, %c0_14, %c0_15], %30 {strides = array<i32>} : memref<1x4x8x16xf32, #tpu.memory_space<vmem>>, vector<1x1x8x16xf32>,
    return
  }
  func.func @transform_0(%arg0: i32, %arg1: i32) -> (i32, i32, i32, i32) {
    %c0_i32 = arith.constant 0 : i32
    %c0_i32_0 = arith.constant 0 : i32
    %c0_i32_1 = arith.constant 0 : i32
    return %arg0, %arg1, %c0_i32, %c0_i32_0 : i32, i32, i32, i32
  }
  func.func @transform_1(%arg0: i32, %arg1: i32) -> (i32, i32, i32, i32) {
    %c0_i32 = arith.constant 0 : i32
    %c0_i32_0 = arith.constant 0 : i32
    %c0_i32_1 = arith.constant 0 : i32
    return %arg0, %c0_i32, %arg1, %c0_i32_0 : i32, i32, i32, i32
  }
}

</mosaic_0001>

<bundles_post_ra>
// kernel: tpu_custom_call.1
= control target key start
LH: loop header
LB: loop body
LE: loop exit
PB: predicated region body
PF: predicated region fallthrough
CT: control target
= control target key end

     0   :  { %6 = vsyncpa [#allocation3], 0  ;;  %s3177_s0 = inlined_call_operand.hbm [shape: f32[2,8,8,16], index: 0, kind: input, shape index: {}]   ;;  %s3178_s1 = inlined_call_operand.hbm [shape: f32[2,4,16,16], index: 1, kind: output, shape index: {}]  }
   0x1   :  { %8 = vsyncpa [#allocation3 + $0x1], 0 }
   0x2   :  { %9 = vsyncpa [#allocation4], 0 }
   0x3   :  { %11 = vsyncpa [#allocation4 + $0x1], 0  ;;  %s2642_s6 = smov 0   ;;  %s2644_s7 = smov 0  }
   0x4   :  { %s2646_s8 = smov 0   ;;  %s2648_s9 = smov 0  }
   0x5   :  { %s2650_s10 = smov 0   ;;  %s2652_s11 = smov 0  }
   0x6   :  { %s2654_s12 = smov 0   ;;  %s2656_s13 = smov 0  }
   0x7 LB: > { %s2374_s14 = sadd.s32 4294967295, %s2614_s13   ;;  %s2375_s15 = sadd.s32 4294967294, %s2614_s13   ;;  %s2614_s13 = sphi %s2656_s13, %s17_s13   ;;  %s2610_s12 = sphi %s2654_s12, %s3190_s12   ;;  %s2606_s11 = sphi %s2652_s11, %s3189_s11   ;;  %s2602_s10 = sphi %s2650_s10, %s3188_s10   ;;  %s2598_s9 = sphi %s2648_s9, %s3187_s9   ;;  %s2594_s8 = sphi %s2646_s8, %s3186_s8   ;;  %s2590_s7 = sphi %s2644_s7, %s3185_s7   ;;  %s2586_s6 = sphi %s2642_s6, %s3184_s6  }
   0x8   : > { %s26_s16 = sadd.s32 1, %s2606_s11  ;;  %s29_s17 = sadd.s32 1, %s2610_s12 }
   0x9   : > { %p27_p0 = scmp.ge.s32.totalorder %s26_s16, 2  ;;  %s38_s18 = sadd.s32 1, %s2594_s8 }
   0xa   : > { %p45_p1 = scmp.ne.s32.totalorder %s2594_s8, %s2590_s7  ;;  %p46_p2 = scmp.eq.s32.totalorder %s2614_s13, 0 }
   0xb   : > { %s3192_s16 = smov (%p27_p0, %s26_s16), 0  ;;  %s3194_s17 = smov (!%p27_p0, %s29_s17), %s2610_s12 }
   0xc   : > { %s34_s19 = ssub.s32 %s2606_s11, %s3192_s16  ;;  %p2695_p3 = por %p46_p2, %p45_p1 }
   0xd   : > { %p31_p4 = scmp.ge.s32.totalorder %s3194_s17, 2  ;;  %p51_p5 = scmp.ne.s32.totalorder %s2590_s7, %s2586_s6 }
   0xe   : > { %p52_p6 = scmp.eq.s32.totalorder %s2374_s14, 0  ;;  %p77_p7 = scmp.eq.s32.totalorder %s2374_s14, 3 }
   0xf   : > { %s3196_s17 = smov (%p31_p4, %s3194_s17), 0  ;;  %p83_p10 = scmp.eq.s32.totalorder %s2375_s15, 3 }
  0x10   : > { %p2703_p8 = por %p52_p6, %p51_p5  ;;  %p2707_p9 = por %p77_p7, %p45_p1 }
  0x11   : > { %s33_s23 = ssub.s32 %s2610_s12, %s3196_s17  ;;  %p2713_p12 = por %p83_p10, %p51_p5 }
  0x12   : > { %s35_s24 = sor.u32 %s34_s19, %s33_s23  ;;  %p2409_p13 = scmp.lt.s32.totalorder %s2614_s13, 4 }
  0x13   : > { %p36_p11 = scmp.eq.s32.totalorder %s35_s24, 0  ;;  %s103_s26 = sand.u32 1, %s2594_s8  }
  0x14   : > { %s2378_s28 = sshll.u32 %s103_s26, 5  ;;  %s2379_s29 = sshll.u32 %s2606_s11, 2 }
  0x15   : > { %s2720_s27 = scalar_select %p36_p11, %s2594_s8, %s38_s18  }
  0x16   : > { %s2380_s30 = sshll.u32 %s2610_s12, 3  ;;  %s107_s2 = scalar_lea.vmem [#allocation2], %s2378_s28 }
  0x17   : > { %s116_s3 = sshll.u32 %s107_s2, 4  ;;  %s113_s4 = sadd.s32 %s2380_s30, %s2379_s29  ;;  %s117_s3 = int_to_ptr.vmem [resolvable:$true] %s116_s3 }
  0x18   : > { %s2381_s5 = sshll.u32 %s113_s4, 7  ;;  %p2726_p0 = pnand %p2409_p13, %p2695_p3 }
  0x19   : > { %s115_s23 = scalar_lea.hbm %s3177_s0, %s2381_s5  ;;  %s104_s18 = scalar_lea.sflag [#allocation3], %s103_s26 }
  0x1a   : > { %p2492_p1 = pneg %p2726_p0  ;;  %s2503_s24 = scalar_lea.vmem %s117_s3, 512 }
  0x1b   : > { %p2504_p2 = scmp.ne.s32.totalorder %s117_s3, %s2503_s24  ;;  %s2616_s28 = smov [#allocation2]  }
  0x1c   : > { %s2508_s29 = sshll.u32 %s2616_s28, 4  ;;  %s2509_s29 = int_to_ptr.vmem [resolvable:$false] %s2508_s29 }
  0x1d   : > { %p2506_p4 = pnand %p2504_p2, %p2492_p1  ;;  %s2510_s20 = scalar_lea.vmem %s2509_s29, 1024 }
  0x1e   : > { %p2511_p3 = scmp.lt.s32.totalorder %s117_s3, %s2509_s29  ;;  %p2512_p6 = scmp.lt.s32.totalorder %s2510_s20, %s2503_s24 }
  0x1f   : > { %p2507_p5 = pneg %p2506_p4 }
  0x20   : > { %p2513_p7 = por %p2512_p6, %p2511_p3 }
  0x22   : > { %p2514_p10 = pnand %p2513_p7, %p2507_p5 }
  0x24   : > { %2517 = shalt.err (!%p2514_p10)
}
  0x25   : > { %s2617_s30 = smov 128   ;;  %s2618_s26 = smov 8  }
  0x26   : > { %2404 = dma.hbm_to_vmem [thread:$0]  (!%p2726_p0), %s115_s23, 512, %s117_s3, %s104_s18, %s2617_s30, %s2617_s30, %s2618_s26  }
  0x27   : > { %p2382_p11 = scmp.ge.s32.totalorder %s2614_s13, 1  ;;  %p124_p13 = scmp.lt.s32.totalorder %s2614_s13, 5 }
  0x29   : > { %p125_p1 = pnand %p2382_p11, %p124_p13 }
  0x2a   : > { %s2740_s2 = sand.u32 (!%p125_p1), 1, %s2590_s7  }
  0x2b   : > { %128 = sbr.rel (%p125_p1) target bundleno = 564 (0x234), region = 24  ;;  %s2383_s4 = sshll.u32 (!%p125_p1), %s2740_s2, 5 }
  0x2c   : > { %s131_s5 = scalar_lea.sflag (!%p125_p1), [#allocation3], %s2740_s2  ;;  %s134_s15 = scalar_lea.vmem (!%p125_p1), [#allocation2], %s2383_s4 }
  0x30   : > { %2577 = dma.done.wait (%p2703_p8), %s131_s5, 512  }
  0x31   : > { %2579 = vsyncadd (%p2703_p8), %s131_s5, 4294966784  ;;  %v2750_v0 = vld [vmem:[%s134_s15 + $0x10] sm:$0xff]  ;;  %v2752_v1 = vld [vmem:[%s134_s15] sm:$0xff]  ;;  %s2619_s3 = smov 126   ;;  %s2620_s14 = smov 124   ;;  %v251_v12 = vlaneseq  ;;  %vm2208_vm0 = vcmask 130048  }
  0x32   : > { %166 = vrot.lane.b32.xlu1 %v2750_v0, %s2619_s3  ;;  %162 = vrot.lane.b32.xlu0 %v2752_v1, %s2619_s3  ;;  %v2756_v2 = vld [vmem:[%s134_s15 + $0x18] sm:$0xff]  ;;  %v2758_v3 = vld [vmem:[%s134_s15 + $0x8] sm:$0xff]  ;;  %s2621_s21 = smov 122   ;;  %s2622_s19 = smov 120   ;;  %v2626_v10 = vmov 1983009808  }
  0x33   : > { %s2623_s23 = smov 118   ;;  %s2624_s18 = smov 116   ;;  %v249_v11 = vunpack.c.l.s4 %v2626_v10  ;;  %v2800_v16 = vshrl.u32 %v251_v12, 7  ;;  %v2627_v59 = vmov 1934713408  }
  0x34   : > { %s2625_s24 = smov 114   ;;  %v313_v60 = vunpack.c.l.s4 %v2627_v59  ;;  %s2393_s28 = sshll.u32 %s2602_s10, 3 }
  0x35   : > { %v250_v15 = vunpack.c.0.s8 %v249_v11  ;;  %s2282_s29 = sadd.s32 %s2598_s9, %s2393_s28  ;;  %s152_s20 = scalar_lea.vmem [#allocation5], %s2383_s4 }
  0x36   : > { %168 = vrot.lane.b32.xlu1 %v2756_v2, %s2619_s3  ;;  %164 = vrot.lane.b32.xlu0 %v2758_v3, %s2619_s3  ;;  %s2285_s30 = sshll.u32 %s152_s20, 4  ;;  %s2394_s9 = sshll.u32 %s2282_s29, 7  ;;  %s3117_s30 = int_to_ptr.vmem [resolvable:$true] %s2285_s30 }
  0x37   : > { %v2806_v22 = vsub.s32 %v250_v15, %v2800_v16  ;;  %s3124_s4 = scalar_lea.hbm %s3178_s1, %s2394_s9  ;;  %s2271_s5 = scalar_lea.sflag [#allocation4], %s2740_s2 }
  0x38   : > { %s2518_s15 = scalar_lea.vmem %s3117_s30, 512  ;;  %s2628_s3 = smov [#allocation5]  }
  0x39   : > { %p2519_p8 = scmp.ne.s32.totalorder %s3117_s30, %s2518_s15 }
  0x3a   : > { %176 = vrot.lane.b32.xlu1 %v2758_v3, %s2620_s14  ;;  %174 = vrot.lane.b32.xlu0 %v2752_v1, %s2620_s14 }
  0x3b   : > { %p2520_p0 = pnand %p2519_p8, %p2707_p9 }
  0x3d   : > { %p2521_p2 = pneg %p2520_p0 }
  0x3e   : > { %180 = vrot.lane.b32.xlu1 %v2756_v2, %s2620_s14  ;;  %178 = vrot.lane.b32.xlu0 %v2750_v0, %s2620_s14  ;;  %s2522_s14 = sshll.u32 %s2628_s3, 4  ;;  %s2523_s14 = int_to_ptr.vmem [resolvable:$false] %s2522_s14 }
  0x3f   : > { %p2525_p4 = scmp.lt.s32.totalorder %s3117_s30, %s2523_s14 }
  0x42   : > { %188 = vrot.lane.b32.xlu1 %v2758_v3, %s2621_s21  ;;  %186 = vrot.lane.b32.xlu0 %v2752_v1, %s2621_s21 }
  0x46   : > { %192 = vrot.lane.b32.xlu1 %v2756_v2, %s2621_s21  ;;  %190 = vrot.lane.b32.xlu0 %v2750_v0, %s2621_s21  ;;  %s2524_s21 = scalar_lea.vmem %s2523_s14, 1024 }
  0x47   : > { %p2526_p5 = scmp.lt.s32.totalorder %s2524_s21, %s2518_s15 }
  0x49   : > { %p2527_p3 = por %p2526_p5, %p2525_p4 }
  0x4a   : > { %200 = vrot.lane.b32.xlu1 %v2758_v3, %s2622_s19  ;;  %198 = vrot.lane.b32.xlu0 %v2752_v1, %s2622_s19 }
  0x4b   : > { %p2528_p6 = pnand %p2527_p3, %p2521_p2 }
  0x4e   : > { %204 = vrot.lane.b32.xlu1 %v2756_v2, %s2622_s19  ;;  %202 = vrot.lane.b32.xlu0 %v2750_v0, %s2622_s19 }
  0x52   : > { %212 = vrot.lane.b32.xlu1 %v2758_v3, %s2623_s23  ;;  %210 = vrot.lane.b32.xlu0 %v2752_v1, %s2623_s23 }
  0x56   : > { %216 = vrot.lane.b32.xlu1 %v2756_v2, %s2623_s23  ;;  %214 = vrot.lane.b32.xlu0 %v2750_v0, %s2623_s23 }
  0x5a   : > { %224 = vrot.lane.b32.xlu1 %v2758_v3, %s2624_s18  ;;  %222 = vrot.lane.b32.xlu0 %v2752_v1, %s2624_s18 }
  0x5e   : > { %228 = vrot.lane.b32.xlu1 %v2756_v2, %s2624_s18  ;;  %226 = vrot.lane.b32.xlu0 %v2750_v0, %s2624_s18 }
  0x62   : > { %236 = vrot.lane.b32.xlu1 %v2758_v3, %s2625_s24  ;;  %234 = vrot.lane.b32.xlu0 %v2752_v1, %s2625_s24 }
  0x66   : > { %240 = vrot.lane.b32.xlu1 %v2756_v2, %s2625_s24  ;;  %238 = vrot.lane.b32.xlu0 %v2750_v0, %s2625_s24 }
  0xa4   : > { %v2786_v4 = vpop.permute.xlu1 %166  ;;  %v163_v5 = vpop.permute.xlu0 %162 }
  0xa8   : > { %v2788_v6 = vpop.permute.xlu1 %168  ;;  %v2790_v7 = vpop.permute.xlu0 %164 }
  0xac   : > { %v2792_v8 = vpop.permute.xlu1 %176  ;;  %v2794_v9 = vpop.permute.xlu0 %174 }
  0xad   : > { %v383_v20 = vcombine.high %v2758_v3, %v2792_v8  ;;  %v247_v23 = vcombine.high %v2752_v1, %v2794_v9  ;;  %v382_v61 = vcombine.low %v2758_v3, %v2792_v8  ;;  %v246_v62 = vcombine.low %v2752_v1, %v2794_v9 }
  0xaf   : > { %v2821_v29 = vrot.slane %v383_v20, %v2806_v22  ;;  %v2832_v33 = vrot.slane %v247_v23, %v2806_v22  ;;  %v390_v9 = vrot.slane %v382_v61, %v2806_v22 }
  0xb0   : > { %v2796_v13 = vpop.permute.xlu1 %180  ;;  %v2798_v14 = vpop.permute.xlu0 %178 }
  0xb1   : > { %v655_v26 = vcombine.high %v2756_v2, %v2796_v13  ;;  %v519_v32 = vcombine.high %v2750_v0, %v2798_v14  ;;  %v654_v3 = vcombine.low %v2756_v2, %v2796_v13  ;;  %v518_v1 = vcombine.low %v2750_v0, %v2798_v14 }
  0xb3   : > { %v2839_v36 = vrot.slane %v655_v26, %v2806_v22  ;;  %v2856_v43 = vrot.slane %v519_v32, %v2806_v22 }
  0xb4   : > { %v189_v17 = vpop.permute.xlu1 %188  ;;  %v187_v18 = vpop.permute.xlu0 %186 }
  0xb5   : > { %v399_v19 = vcombine.high %v2790_v7, %v189_v17  ;;  %v263_v21 = vcombine.high %v163_v5, %v187_v18  ;;  %v262_v56 = vcombine.low %v163_v5, %v187_v18  ;;  %v398_v63 = vcombine.low %v2790_v7, %v189_v17 }
  0xb6   : > { %v314_v18 = vunpack.c.0.s8 %v313_v60  ;;  %v254_v17 = vrot.slane %v246_v62, %v2806_v22 }
  0xb7   : > { %v2824_v30 = vrot.slane %v399_v19, %v2806_v22  ;;  %v2827_v31 = vrot.slane %v263_v21, %v2806_v22  ;;  %v270_v10 = vrot.slane %v262_v56, %v2806_v22  ;;  %v406_v19 = vrot.slane %v398_v63, %v2806_v22 }
  0xb8   : > { %v2810_v24 = vpop.permute.xlu1 %192  ;;  %v2812_v25 = vpop.permute.xlu0 %190 }
  0xb9   : > { %v671_v27 = vcombine.high %v2788_v6, %v2810_v24  ;;  %v535_v28 = vcombine.high %v2786_v4, %v2812_v25  ;;  %v326_v39 = vcombine.low %v2832_v33, %v2827_v31  ;;  %v327_v40 = vcombine.high %v2832_v33, %v2827_v31 }
  0xba   : > { %v462_v41 = vcombine.low %v2821_v29, %v2824_v30  ;;  %v463_v42 = vcombine.high %v2821_v29, %v2824_v30  ;;  %v670_v20 = vcombine.low %v2788_v6, %v2810_v24  ;;  %v534_v2 = vcombine.low %v2786_v4, %v2812_v25 }
  0xbb   : > { %v2842_v37 = vrot.slane %v671_v27, %v2806_v22  ;;  %v2845_v38 = vrot.slane %v535_v28, %v2806_v22  ;;  %v310_v26 = vcombine.low %v254_v17, %v270_v10  ;;  %v2920_v27 = vsub.s32 %v314_v18, %v2800_v16 }
  0xbc   : > { %v2834_v34 = vpop.permute.xlu1 %200  ;;  %v2836_v35 = vpop.permute.xlu0 %198  ;;  %v2923_v28 = vrot.slane %v654_v3, %v2806_v22  ;;  %v2926_v6 = vrot.slane %v518_v1, %v2806_v22  ;;  %v446_v32 = vcombine.low %v390_v9, %v406_v19  ;;  %v2930_v60 = vrot.slane %v670_v20, %v2806_v22 }
  0xbd   : > { %v598_v46 = vcombine.low %v2856_v43, %v2845_v38  ;;  %v599_v47 = vcombine.high %v2856_v43, %v2845_v38  ;;  %v734_v48 = vcombine.low %v2839_v36, %v2842_v37  ;;  %v735_v49 = vcombine.high %v2839_v36, %v2842_v37 }
  0xbe   : > { %v2933_v61 = vrot.slane %v534_v2, %v2806_v22  ;;  %v311_v16 = vcombine.high %v254_v17, %v270_v10  ;;  %v447_v62 = vcombine.high %v390_v9, %v406_v19  ;;  %v454_v19 = vrot.slane %v446_v32, %v2920_v27 }
  0xbf   : > { %v477_v31 = vrot.slane %v463_v42, %v2920_v27 }
  0xc0   : > { %v2858_v44 = vpop.permute.xlu1 %204  ;;  %v2860_v45 = vpop.permute.xlu0 %202  ;;  %v325_v2 = vrot.slane %v311_v16, %v2920_v27 }
  0xc4   : > { %v2870_v50 = vpop.permute.xlu1 %212  ;;  %v2872_v51 = vpop.permute.xlu0 %210 }
  0xc8   : > { %v2874_v52 = vpop.permute.xlu1 %216  ;;  %v2876_v53 = vpop.permute.xlu0 %214 }
  0xcc   : > { %v2878_v54 = vpop.permute.xlu1 %224  ;;  %v2880_v55 = vpop.permute.xlu0 %222 }
  0xcd   : > { %v414_v11 = vcombine.low %v2834_v34, %v2878_v54  ;;  %v278_v5 = vcombine.low %v2836_v35, %v2880_v55 }
  0xcf   : > { %v422_v14 = vrot.slane %v414_v11, %v2806_v22  ;;  %v286_v21 = vrot.slane %v278_v5, %v2806_v22  ;;  %v318_v5 = vrot.slane %v310_v26, %v2920_v27 }
  0xd0   : > { %v2882_v57 = vpop.permute.xlu1 %228  ;;  %v2884_v58 = vpop.permute.xlu0 %226 }
  0xd1   : > { %v550_v63 = vcombine.low %v2860_v45, %v2884_v58  ;;  %v551_v3 = vcombine.high %v2860_v45, %v2884_v58  ;;  %v582_v45 = vcombine.low %v2926_v6, %v2933_v61 }
  0xd3   : > { %v558_v58 = vrot.slane %v550_v63, %v2806_v22 }
  0xd4   : > { %v2896_v12 = vpop.permute.xlu1 %236  ;;  %v2898_v15 = vpop.permute.xlu0 %234 }
  0xd5   : > { %v430_v7 = vcombine.low %v2870_v50, %v2896_v12  ;;  %v294_v8 = vcombine.low %v2872_v51, %v2898_v15 }
  0xd7   : > { %v438_v0 = vrot.slane %v430_v7, %v2806_v22  ;;  %v302_v13 = vrot.slane %v294_v8, %v2806_v22 }
  0xd8   : > { %v239_v23 = vpop.permute.xlu0 %238  ;;  %v241_v24 = vpop.permute.xlu1 %240 }
  0xd9   : > { %v566_v4 = vcombine.low %v2876_v53, %v239_v23  ;;  %v342_v25 = vcombine.low %v286_v21, %v302_v13  ;;  %v478_v56 = vcombine.low %v422_v14, %v438_v0  ;;  %v343_v59 = vcombine.high %v286_v21, %v302_v13 }
  0xda   : > { %v567_v11 = vcombine.high %v2876_v53, %v239_v23  ;;  %v703_v1 = vcombine.high %v2874_v52, %v241_v24  ;;  %v479_v8 = vcombine.high %v422_v14, %v438_v0  ;;  %v687_v53 = vcombine.high %v2858_v44, %v2882_v57 }
  0xdb   : > { %v350_v18 = vrot.slane %v342_v25, %v2920_v27  ;;  %v574_v7 = vrot.slane %v566_v4, %v2806_v22  ;;  %v486_v9 = vrot.slane %v478_v56, %v2920_v27  ;;  %v357_v17 = vrot.slane %v343_v59, %v2920_v27 }
  0xdc   : > { %v702_v0 = vcombine.low %v2874_v52, %v241_v24  ;;  %v581_v13 = vrot.slane %v567_v11, %v2806_v22  ;;  %v686_v14 = vcombine.low %v2858_v44, %v2882_v57  ;;  %v565_v21 = vrot.slane %v551_v3, %v2806_v22 }
  0xdd   : > { %v375_v20 = vcombine.high %v318_v5, %v350_v18  ;;  %v374_v10 = vcombine.low %v318_v5, %v350_v18  ;;  %v461_v23 = vrot.slane %v447_v62, %v2920_v27  ;;  %v493_v26 = vrot.slane %v479_v8, %v2920_v27 }
  0xde   : > { %v717_v4 = vrot.slane %v703_v1, %v2806_v22  ;;  %v511_v25 = vcombine.high %v454_v19, %v486_v9  ;;  %v376_v32 = vcombine.low %v325_v2, %v357_v17  ;;  %v614_v56 = vcombine.low %v558_v58, %v574_v7 }
  0xdf   : > { %822 = vxpose.xlu1.b32.start.end [1/1] (short) (narrow) %v375_v20, 8  ;;  %790 = vxpose.xlu0.b32.start.end [1/1] (short) (narrow) %v374_v10, 8  ;;  %v590_v52 = vrot.slane %v582_v45, %v2920_v27  ;;  %v583_v24 = vcombine.high %v2926_v6, %v2933_v61  ;;  %v2968_v44 = vrot.slane %v598_v46, %v2920_v27 }
  0xe0   : > { %v2974_v57 = vrot.slane %v599_v47, %v2920_v27  ;;  %v701_v59 = vrot.slane %v687_v53, %v2806_v22  ;;  %v710_v16 = vrot.slane %v702_v0, %v2806_v22  ;;  %v630_v62 = vcombine.low %v565_v21, %v581_v13 }
  0xe1   : > { %v694_v6 = vrot.slane %v686_v14, %v2806_v22  ;;  %v513_v61 = vcombine.high %v461_v23, %v493_v26  ;;  %v615_v63 = vcombine.high %v558_v58, %v574_v7  ;;  %v631_v11 = vcombine.high %v565_v21, %v581_v13 }
  0xe2   : > { %v377_v46 = vcombine.high %v325_v2, %v357_v17  ;;  %v622_v5 = vrot.slane %v614_v56, %v2920_v27  ;;  %v2981_v18 = vrot.slane %v630_v62, %v2920_v27  ;;  %v766_v38 = vcombine.low %v701_v59, %v717_v4 }
  0xe3   : > { %1078 = vxpose.xlu1.b32.start.end [1/1] (short) (narrow) %v511_v25, 8  ;;  %854 = vxpose.xlu0.b32.start.end [1/1] (short) (narrow) %v376_v32, 8  ;;  %v2984_v43 = vrot.slane %v631_v11, %v2920_v27  ;;  %v2990_v47 = vrot.slane %v734_v48, %v2920_v27  ;;  %v2996_v3 = vrot.slane %v735_v49, %v2920_v27 }
  0xe4   : > { %v767_v1 = vcombine.high %v701_v59, %v717_v4  ;;  %v295_v7 = vcombine.high %v2872_v51, %v2898_v15  ;;  %v750_v8 = vcombine.low %v694_v6, %v710_v16  ;;  %v651_v20 = vcombine.high %v2968_v44, %v2981_v18 }
  0xe5   : > { %v510_v10 = vcombine.low %v454_v19, %v486_v9  ;;  %v629_v48 = vrot.slane %v615_v63, %v2920_v27  ;;  %v653_v17 = vcombine.high %v2974_v57, %v2984_v43  ;;  %v3006_v36 = vrot.slane %v766_v38, %v2920_v27 }
  0xe6   : > { %v647_v37 = vcombine.high %v590_v52, %v622_v5  ;;  %v650_v49 = vcombine.low %v2968_v44, %v2981_v18  ;;  %v3011_v51 = vrot.slane %v767_v1, %v2920_v27  ;;  %v652_v15 = vcombine.low %v2974_v57, %v2984_v43 }
  0xe7   : > { %1142 = vxpose.xlu1.b32.start.end [1/1] (short) (narrow) %v513_v61, 8  ;;  %886 = vxpose.xlu0.b32.start.end [1/1] (short) (narrow) %v377_v46, 8  ;;  %v597_v9 = vrot.slane %v583_v24, %v2920_v27  ;;  %v718_v53 = vcombine.low %v2923_v28, %v2930_v60  ;;  %v787_v19 = vcombine.high %v2990_v47, %v3006_v36 }
  0xe8   : > { %v786_v2 = vcombine.low %v2990_v47, %v3006_v36  ;;  %v279_v45 = vcombine.high %v2836_v35, %v2880_v55  ;;  %v789_v58 = vcombine.high %v2996_v3, %v3011_v51  ;;  %v788_v0 = vcombine.low %v2996_v3, %v3011_v51 }
  0xe9   : > { %v309_v13 = vrot.slane %v295_v7, %v2806_v22  ;;  %v512_v14 = vcombine.low %v461_v23, %v493_v26  ;;  %v649_v21 = vcombine.high %v597_v9, %v629_v48  ;;  %v758_v4 = vrot.slane %v750_v8, %v2920_v27 }
  0xea   : > { %v751_v25 = vcombine.high %v694_v6, %v710_v16  ;;  %v293_v32 = vrot.slane %v279_v45, %v2806_v22  ;;  %v726_v35 = vrot.slane %v718_v53, %v2920_v27  ;;  %v719_v55 = vcombine.high %v2923_v28, %v2930_v60 }
  0xeb   : > { %1046 = vxpose.xlu0.b32.start.end [1/1] (short) (narrow) %v510_v10, 8  ;;  %1334 = vxpose.xlu1.b32.start.end [1/1] (short) (narrow) %v647_v37, 8  ;;  %v431_v56 = vcombine.high %v2870_v50, %v2896_v12  ;;  %v646_v59 = vcombine.low %v590_v52, %v622_v5  ;;  %v415_v16 = vcombine.high %v2834_v34, %v2878_v54 }
  0xec   : > { %v783_v24 = vcombine.high %v726_v35, %v758_v4  ;;  %v765_v23 = vrot.slane %v751_v25, %v2920_v27  ;;  %v358_v26 = vcombine.low %v293_v32, %v309_v13  ;;  %v733_v62 = vrot.slane %v719_v55, %v2920_v27 }
  0xed   : > { %v445_v6 = vrot.slane %v431_v56, %v2806_v22  ;;  %v648_v63 = vcombine.low %v597_v9, %v629_v48  ;;  %v359_v60 = vcombine.high %v293_v32, %v309_v13  ;;  %v429_v50 = vrot.slane %v415_v16, %v2806_v22 }
  0xee   : > { %v785_v61 = vcombine.high %v733_v62, %v765_v23  ;;  %v366_v28 = vrot.slane %v358_v26, %v2920_v27  ;;  %v334_v34 = vrot.slane %v326_v39, %v2920_v27  ;;  %v782_v12 = vcombine.low %v726_v35, %v758_v4 }
  0xef   : > { %1110 = vxpose.xlu0.b32.start.end [1/1] (short) (narrow) %v512_v14, 8  ;;  %1398 = vxpose.xlu1.b32.start.end [1/1] (short) (narrow) %v649_v21, 8  ;;  %v373_v52 = vrot.slane %v359_v60, %v2920_v27  ;;  %v494_v11 = vcombine.low %v429_v50, %v445_v6  ;;  %v341_v46 = vrot.slane %v327_v40, %v2920_v27 }
  0xf0   : > { %v379_v54 = vcombine.high %v334_v34, %v366_v28  ;;  %v784_v38 = vcombine.low %v733_v62, %v765_v23  ;;  %v495_v7 = vcombine.high %v429_v50, %v445_v6  ;;  %v470_v39 = vrot.slane %v462_v41, %v2920_v27 }
  0xf1   : > { %v381_v5 = vcombine.high %v341_v46, %v373_v52  ;;  %v502_v1 = vrot.slane %v494_v11, %v2920_v27  ;;  %v378_v10 = vcombine.low %v334_v34, %v366_v28  ;;  %v380_v40 = vcombine.low %v341_v46, %v373_v52 }
  0xf2   : > { %v509_v48 = vrot.slane %v495_v7, %v2920_v27 }
  0xf3   : > { %1590 = vxpose.xlu1.b32.start.end [1/1] (short) (narrow) %v783_v24, 8  ;;  %1302 = vxpose.xlu0.b32.start.end [1/1] (short) (narrow) %v646_v59, 8  ;;  %v515_v8 = vcombine.high %v470_v39, %v502_v1  ;;  %v514_v37 = vcombine.low %v470_v39, %v502_v1 }
  0xf4   : > { %v517_v33 = vcombine.high %v477_v31, %v509_v48  ;;  %v516_v41 = vcombine.low %v477_v31, %v509_v48 }
  0xf7   : > { %1654 = vxpose.xlu1.b32.start.end [1/1] (short) (narrow) %v785_v61, 8  ;;  %1366 = vxpose.xlu0.b32.start.end [1/1] (short) (narrow) %v648_v63, 8 }
  0xfb   : > { %950 = vxpose.xlu1.b32.start.end [1/1] (short) (narrow) %v379_v54, 8  ;;  %1558 = vxpose.xlu0.b32.start.end [1/1] (short) (narrow) %v782_v12, 8 }
  0xff   : > { %1014 = vxpose.xlu1.b32.start.end [1/1] (short) (narrow) %v381_v5, 8  ;;  %1622 = vxpose.xlu0.b32.start.end [1/1] (short) (narrow) %v784_v38, 8 }
 0x103   : > { %1206 = vxpose.xlu1.b32.start.end [1/1] (short) (narrow) %v515_v8, 8  ;;  %918 = vxpose.xlu0.b32.start.end [1/1] (short) (narrow) %v378_v10, 8 }
 0x107   : > { %1270 = vxpose.xlu1.b32.start.end [1/1] (short) (narrow) %v517_v33, 8  ;;  %982 = vxpose.xlu0.b32.start.end [1/1] (short) (narrow) %v380_v40, 8 }
 0x10b   : > { %1462 = vxpose.xlu1.b32.start.end [1/1] (short) (narrow) %v651_v20, 8  ;;  %1174 = vxpose.xlu0.b32.start.end [1/1] (short) (narrow) %v514_v37, 8 }
 0x10f   : > { %1526 = vxpose.xlu1.b32.start.end [1/1] (short) (narrow) %v653_v17, 8  ;;  %1238 = vxpose.xlu0.b32.start.end [1/1] (short) (narrow) %v516_v41, 8 }
 0x113   : > { %1718 = vxpose.xlu1.b32.start.end [1/1] (short) (narrow) %v787_v19, 8  ;;  %1430 = vxpose.xlu0.b32.start.end [1/1] (short) (narrow) %v650_v49, 8 }
 0x117   : > { %1782 = vxpose.xlu1.b32.start.end [1/1] (short) (narrow) %v789_v58, 8  ;;  %1494 = vxpose.xlu0.b32.start.end [1/1] (short) (narrow) %v652_v15, 8 }
 0x11b   : > { %1686 = vxpose.xlu0.b32.start.end [1/1] (short) (narrow) %v786_v2, 8 }
 0x11f   : > { %1750 = vxpose.xlu0.b32.start.end [1/1] (short) (narrow) %v788_v0, 8 }
 0x15b   : > { %v838_v29 = vpop.trf.xlu1  ;;  %v806_v30 = vpop.trf.xlu0 }
 0x15c   : > { %v1846_v20 = vcombine.low %v806_v30, %v838_v29 }
 0x15e   : > { %v1854_v49 = vrot.slane %v1846_v20, %v2806_v22 }
 0x15f   : > { %v870_v42 = vpop.trf.xlu0  ;;  %v1094_v27 = vpop.trf.xlu1 }
 0x163   : > { %v902_v44 = vpop.trf.xlu0  ;;  %v1158_v18 = vpop.trf.xlu1 }
 0x164   : > { %v1847_v17 = vcombine.low %v870_v42, %v902_v44 }
 0x166   : > { %v1861_v57 = vrot.slane %v1847_v17, %v2806_v22 }
 0x167   : > { %v1062_v43 = vpop.trf.xlu0  ;;  %v1350_v15 = vpop.trf.xlu1 }
 0x168   : > { %v1862_v47 = vcombine.low %v1854_v49, %v1861_v57  ;;  %v1880_v36 = vcombine.low %v1062_v43, %v1094_v27 }
 0x16a   : > { %1990 = vxpose.xlu0.b32.start [1/2] (short) (narrow) %v1862_v47, 8  ;;  %v1888_v53 = vrot.slane %v1880_v36, %v2806_v22 }
 0x16b   : > { %v1126_v9 = vpop.trf.xlu0  ;;  %v1414_v3 = vpop.trf.xlu1 }
 0x16c   : > { %v1881_v51 = vcombine.low %v1126_v9, %v1158_v18 }
 0x16e   : > { %v1895_v19 = vrot.slane %v1881_v51, %v2806_v22 }
 0x16f   : > { %v1318_v2 = vpop.trf.xlu0  ;;  %v1606_v45 = vpop.trf.xlu1 }
 0x170   : > { %v1896_v58 = vcombine.low %v1888_v53, %v1895_v19  ;;  %v1914_v26 = vcombine.low %v1318_v2, %v1350_v15 }
 0x172   : > { %2022 = vxpose.xlu1.b32.start [1/2] (short) (narrow) %v1896_v58, 8  ;;  %v1922_v60 = vrot.slane %v1914_v26, %v2806_v22 }
 0x173   : > { %v1382_v0 = vpop.trf.xlu0  ;;  %v1670_v13 = vpop.trf.xlu1 }
 0x174   : > { %v1915_v59 = vcombine.low %v1382_v0, %v1414_v3 }
 0x176   : > { %v1929_v63 = vrot.slane %v1915_v59, %v2806_v22 }
 0x177   : > { %v1574_v14 = vpop.trf.xlu0  ;;  %v966_v21 = vpop.trf.xlu1 }
 0x178   : > { %v1930_v52 = vcombine.low %v1922_v60, %v1929_v63  ;;  %v1948_v46 = vcombine.low %v1574_v14, %v1606_v45 }
 0x17a   : > { %v1956_v8 = vrot.slane %v1948_v46, %v2806_v22 }
 0x17b   : > { %v1638_v4 = vpop.trf.xlu0  ;;  %v1030_v25 = vpop.trf.xlu1 }
 0x17c   : > { %v1949_v54 = vcombine.low %v1638_v4, %v1670_v13 }
 0x17e   : > { %v1963_v7 = vrot.slane %v1949_v54, %v2806_v22 }
 0x17f   : > { %v934_v32 = vpop.trf.xlu0  ;;  %v1222_v35 = vpop.trf.xlu1 }
 0x180   : > { %v1863_v55 = vcombine.low %v934_v32, %v966_v21  ;;  %v1964_v40 = vcombine.low %v1956_v8, %v1963_v7 }
 0x182   : > { %v1871_v16 = vrot.slane %v1863_v55, %v2806_v22 }
 0x183   : > { %v998_v56 = vpop.trf.xlu0  ;;  %v1286_v24 = vpop.trf.xlu1 }
 0x184   : > { %v1864_v23 = vcombine.low %v998_v56, %v1030_v25 }
 0x186   : > { %v1878_v62 = vrot.slane %v1864_v23, %v2806_v22 }
 0x187   : > { %v1190_v6 = vpop.trf.xlu0  ;;  %v1478_v61 = vpop.trf.xlu1 }
 0x188   : > { %v1879_v28 = vcombine.low %v1871_v16, %v1878_v62  ;;  %v1897_v50 = vcombine.low %v1190_v6, %v1222_v35 }
 0x18a   : > { %1991 = vxpose.xlu0.b32.end [2/2] (short) (narrow) %v1879_v28, 8  ;;  %v1905_v5 = vrot.slane %v1897_v50, %v2806_v22 }
 0x18b   : > { %v1254_v34 = vpop.trf.xlu0  ;;  %v1542_v11 = vpop.trf.xlu1 }
 0x18c   : > { %v1898_v12 = vcombine.low %v1254_v34, %v1286_v24 }
 0x18e   : > { %v1912_v38 = vrot.slane %v1898_v12, %v2806_v22  ;;  %2054 = vxpose.xlu0.b32.start [1/2] (short) (narrow) %v1930_v52, 8 }
 0x18f   : > { %v1446_v1 = vpop.trf.xlu0  ;;  %v1734_v31 = vpop.trf.xlu1 }
 0x190   : > { %v1913_v39 = vcombine.low %v1905_v5, %v1912_v38  ;;  %v1931_v10 = vcombine.low %v1446_v1, %v1478_v61 }
 0x192   : > { %2023 = vxpose.xlu1.b32.end [2/2] (short) (narrow) %v1913_v39, 8  ;;  %v1939_v37 = vrot.slane %v1931_v10, %v2806_v22 }
 0x193   : > { %v1510_v48 = vpop.trf.xlu0  ;;  %v1798_v42 = vpop.trf.xlu1 }
 0x194   : > { %v1932_v33 = vcombine.low %v1510_v48, %v1542_v11 }
 0x196   : > { %v1946_v41 = vrot.slane %v1932_v33, %v2806_v22  ;;  %2086 = vxpose.xlu1.b32.start [1/2] (short) (narrow) %v1964_v40, 8 }
 0x197   : > { %v1702_v29 = vpop.trf.xlu0 }
 0x198   : > { %v1947_v30 = vcombine.low %v1939_v37, %v1946_v41  ;;  %v1965_v27 = vcombine.low %v1702_v29, %v1734_v31 }
 0x19a   : > { %2055 = vxpose.xlu0.b32.end [2/2] (short) (narrow) %v1947_v30, 8  ;;  %v1973_v18 = vrot.slane %v1965_v27, %v2806_v22 }
 0x19b   : > { %v1766_v20 = vpop.trf.xlu0 }
 0x19c   : > { %v1966_v44 = vcombine.low %v1766_v20, %v1798_v42 }
 0x19e   : > { %v1980_v17 = vrot.slane %v1966_v44, %v2806_v22 }
 0x1a0   : > { %v1981_v49 = vcombine.low %v1973_v18, %v1980_v17 }
 0x1a2   : > { %2087 = vxpose.xlu1.b32.end [2/2] (short) (narrow) %v1981_v49, 8 }
 0x202   : > { %v2006_v57 = vpop.trf.xlu0 }
 0x203   : > { %v2122_v47 = vcombine.high %v2006_v57, %v2006_v57  ;;  %v2129_v3 = vrot.slane %v2006_v57, %v2806_v22 }
 0x205   : > { %v2136_v19 = vrot.slane %v2122_v47, %v2806_v22 }
 0x20a   : > { %v2038_v43 = vpop.trf.xlu1 }
 0x20b   : > { %v2139_v15 = vcombine.high %v2038_v43, %v2038_v43  ;;  %v2146_v9 = vrot.slane %v2038_v43, %v2806_v22 }
 0x20d   : > { %v2153_v53 = vrot.slane %v2139_v15, %v2806_v22  ;;  %v2190_v45 = vcombine.low %v2129_v3, %v2146_v9  ;;  %v2385_v58 = vcombine.high %v2129_v3, %v2146_v9 }
 0x20f   : > { %v2230_v4 = vcombine.low %v2136_v19, %v2153_v53  ;;  %v2389_v25 = vcombine.high %v2136_v19, %v2153_v53  ;;  %v2198_v56 = vrot.slane %v2190_v45, %v2806_v22  ;;  %v2218_v24 = vrot.slane %v2385_v58, %v2806_v22 }
 0x211   : > { %v2238_v62 = vrot.slane %v2230_v4, %v2806_v22  ;;  %v2258_v6 = vrot.slane %v2389_v25, %v2806_v22 }
 0x212   : > { %v2070_v36 = vpop.trf.xlu0 }
 0x213   : > { %v2156_v51 = vcombine.high %v2070_v36, %v2070_v36  ;;  %v2163_v2 = vrot.slane %v2070_v36, %v2806_v22 }
 0x215   : > { %v2170_v21 = vrot.slane %v2156_v51, %v2806_v22 }
 0x21a   : > { %v2102_v0 = vpop.trf.xlu1 }
 0x21b   : > { %v2173_v13 = vcombine.high %v2102_v0, %v2102_v0  ;;  %v2180_v14 = vrot.slane %v2102_v0, %v2806_v22 }
 0x21d   : > { %v2187_v32 = vrot.slane %v2173_v13, %v2806_v22  ;;  %v2191_v35 = vcombine.low %v2163_v2, %v2180_v14  ;;  %v2386_v55 = vcombine.high %v2163_v2, %v2180_v14 }
 0x21f   : > { %v2205_v59 = vrot.slane %v2191_v35, %v2806_v22  ;;  %v2225_v23 = vrot.slane %v2386_v55, %v2806_v22  ;;  %v2231_v26 = vcombine.low %v2170_v21, %v2187_v32  ;;  %v2390_v16 = vcombine.high %v2170_v21, %v2187_v32 }
 0x221   : > { %v2206_v61 = vcombine.low %v2198_v56, %v2205_v59  ;;  %v2226_v63 = vcombine.low %v2218_v24, %v2225_v23  ;;  %v2245_v28 = vrot.slane %v2231_v26, %v2806_v22  ;;  %v2265_v60 = vrot.slane %v2390_v16, %v2806_v22 }
 0x223   : > { %2209 = vst.msk [vmem:[%s152_s20] sm:$0xff] %vm2208_vm0, %v2206_v61  ;;  %2387 = vst.msk [vmem:[%s152_s20 + $0x8] sm:$0xff] %vm2208_vm0, %v2226_v63  ;;  %v2246_v50 = vcombine.low %v2238_v62, %v2245_v28  ;;  %v2266_v34 = vcombine.low %v2258_v6, %v2265_v60 }
 0x225   : > { %2388 = vst.msk [vmem:[%s152_s20 + $0x10] sm:$0xff] %vm2208_vm0, %v2246_v50  ;;  %2391 = vst.msk [vmem:[%s152_s20 + $0x18] sm:$0xff] %vm2208_vm0, %v2266_v34 }
 0x226   : > { %2531 = shalt.err (!%p2528_p6)
}
 0x227   : > { %s2532_s19 = scalar_lea.hbm %s3124_s4, 512  ;;  %s2536_s24 = scalar_lea.hbm %s3178_s1, 2048 }
 0x228   : > { %p2533_p7 = scmp.ne.s32.totalorder %s3124_s4, %s2532_s19  ;;  %p2537_p13 = scmp.lt.s32.totalorder %s3124_s4, %s3178_s1 }
 0x229   : > { %p2538_p1 = scmp.lt.s32.totalorder %s2536_s24, %s2532_s19 }
 0x22a   : > { %p2534_p10 = pnand %p2533_p7, %p2707_p9 }
 0x22b   : > { %p2539_p8 = por %p2538_p1, %p2537_p13 }
 0x22c   : > { %p2535_p11 = pneg %p2534_p10 }
 0x22e   : > { %p2540_p0 = pnand %p2539_p8, %p2535_p11 }
 0x230   : > { %2543 = shalt.err (!%p2540_p0)
}
 0x231   : > { %s2629_s20 = smov 128   ;;  %s2630_s9 = smov 256  }
 0x232   : > { %s2631_s10 = smov 8  }
 0x233   : > { %2399 = dma.vmem_to_hbm [thread:$0]  (%p2707_p9), %s3117_s30, 512, %s3124_s4, %s2271_s5, %s2629_s20, %s2630_s9, %s2631_s10  }
 0x234 PF: > { %p2410_p2 = scmp.ge.s32.totalorder %s2614_s13, 2  ;;  %s2300_s26 = sand.u32 1, %s2586_s6  }
 0x235   : > { %s2301_s15 = scalar_lea.sflag [#allocation4], %s2300_s26 }
 0x236   : > { %p2406_p4 = pnand %p2410_p2, %p2713_p12 }
 0x238   : > { %p2407_p5 = pneg %p2406_p4 }
 0x23a   : > { %2581 = dma.done.wait (%p2407_p5), %s2301_s15, 512  }
 0x23b   : > { %2583 = vsyncadd (%p2407_p5), %s2301_s15, 4294966784  ;;  %s17_s13 = sadd.s32 1, %s2614_s13   ;;  %s3184_s6 = smov %s2590_s7 }
 0x23c   : > { %p14_p3 = scmp.ge.s32.totalorder %s17_s13, 6   ;;  %s3185_s7 = smov %s2594_s8 }
 0x23d   : > { %s3186_s8 = smov %s2720_s27  ;;  %s3187_s9 = smov %s2606_s11 }
 0x23e   : > { %s3188_s10 = smov %s2610_s12  ;;  %s3189_s11 = smov %s3192_s16 }
 0x23f   : > { %s3190_s12 = smov %s3196_s17  ;;  %16 = sbr.rel (!%p14_p3) target bundleno = 7 (0x7), region = 72 }
 0x244   :  { %2306 = vsyncpa [#allocation3], 1 }
 0x245   :  { %2308 = vsyncpa [#allocation3 + $0x1], 1 }
 0x246   :  { %2309 = vsyncpa [#allocation4], 1 }
 0x247   :  { %2311 = vsyncpa [#allocation4 + $0x1], 1 }

</bundles_post_ra>
